<compile_context>
chip_gen: v5e
topology: v5e:2x2
jax: 0.10.0
libtpu: 0.0.40
codegen_flags: <defaults>
</compile_context>

<pallas_src>
import functools

import jax
import jax.numpy as jnp
from jax.experimental import pallas as pl
from jax.experimental.pallas import tpu as pltpu

PATCH = 4


# ----------------------------------------------------------------------------
# Pallas kernels
# ----------------------------------------------------------------------------
def _fused_extractor_kernel(use_head, *refs):
    # One batch element per grid step.  Everything (embedding, QKV, scores,
    # softmax, attn@V, head) lives in vregs/VMEM for the whole step.
    if use_head:
        (x_ref, we_ref, be_ref, wqkv_ref, wh_ref, feat_ref, attn_ref) = refs
    else:
        (x_ref, we_ref, be_ref, wqkv_ref, feat_ref, attn_ref) = refs
        wh_ref = None

    x = x_ref[0]  # [N, C*p*p]

    # Patch embedding ("conv") fused in-kernel.
    emb = jnp.dot(x, we_ref[...], preferred_element_type=jnp.float32)
    emb = emb + be_ref[...]                                    # [N, Dbk]

    # Single wide QKV projection (lane-dense: one [N, 3*Dh] matmul).
    qkv = jnp.dot(emb, wqkv_ref[...], preferred_element_type=jnp.float32)
    dh = qkv.shape[-1] // 3
    q = qkv[:, :dh]
    k = qkv[:, dh:2 * dh]
    v = qkv[:, 2 * dh:]

    # Scores: contract on the last axis of both operands — no explicit k.T.
    scale = 1.0 / (dh ** 0.5)
    s = jax.lax.dot_general(
        q, k, dimension_numbers=(((1,), (1,)), ((), ())),
        preferred_element_type=jnp.float32) * scale            # [N, N]

    # Numerically-stable softmax; reciprocal goes to the (idle) EUP slot.
    s = s - jnp.max(s, axis=-1, keepdims=True)
    e = jnp.exp(s)
    p = e * pl.reciprocal(jnp.sum(e, axis=-1, keepdims=True), approx=True)

    o = jnp.dot(p, v, preferred_element_type=jnp.float32)      # [N, Dh]
    if use_head:
        o = jnp.dot(o, wh_ref[...], preferred_element_type=jnp.float32)

    feat_ref[0] = o
    attn_ref[0] = p


def fused_extractor_forward(patches, w_embed, b_embed, w_qkv, w_head, use_head):
    """patches:[B,N,Kdim] -> (features:[B,N,Dout], attentions:[B,N,N])."""
    B, N, Kdim = patches.shape
    Dbk = w_embed.shape[1]
    Dh = w_qkv.shape[1] // 3
    Dout = w_head.shape[1] if use_head else Dh

    in_specs = [
        pl.BlockSpec((1, N, Kdim), lambda b: (b, 0, 0)),
        pl.BlockSpec((Kdim, Dbk), lambda b: (0, 0)),
        pl.BlockSpec((1, Dbk), lambda b: (0, 0)),
        pl.BlockSpec((Dbk, 3 * Dh), lambda b: (0, 0)),
    ]
    operands = [patches, w_embed, b_embed.reshape(1, Dbk), w_qkv]
    if use_head:
        # w_head is only DMA'd when it is actually used.
        in_specs.append(pl.BlockSpec((Dh, Dout), lambda b: (0, 0)))
        operands.append(w_head)

    kernel = functools.partial(_fused_extractor_kernel, use_head)
    return pl.pallas_call(
        kernel,
        out_shape=(
            jax.ShapeDtypeStruct((B, N, Dout), jnp.float32),
            jax.ShapeDtypeStruct((B, N, N), jnp.float32),
        ),
        grid=(B,),
        in_specs=in_specs,
        out_specs=(
            pl.BlockSpec((1, N, Dout), lambda b: (b, 0, 0)),
            pl.BlockSpec((1, N, N), lambda b: (b, 0, 0)),
        ),
        compiler_params=pltpu.CompilerParams(
            dimension_semantics=("parallel",)),
    )(*operands)


def _proto_sim_kernel(x_ref, p_ref, o_ref):
    # scores = normalize(x, dim=-1) @ prototypes^T, with the contraction done
    # on the last axis of both operands (no in-kernel transpose).
    x = x_ref[...]
    inv_norm = jax.lax.rsqrt(jnp.sum(x * x, axis=-1, keepdims=True) + 1e-12)
    xn = x * inv_norm
    o_ref[...] = jax.lax.dot_general(
        xn, p_ref[...], dimension_numbers=(((1,), (1,)), ((), ())),
        preferred_element_type=jnp.float32)


def prototype_similarity(x, prototypes):
    """x:[M,D], prototypes:[P,D] -> scores:[M,P] (row-tiled, 8-aligned)."""
    M, D = x.shape
    P, _ = prototypes.shape
    # Row-block: full (8-padded) M for small inputs, 256-row tiles at scale.
    if M <= 512:
        TM = ((M + 7) // 8) * 8
    else:
        TM = 256
    Mp = ((M + TM - 1) // TM) * TM
    x_p = jnp.pad(x, ((0, Mp - M), (0, 0))) if Mp != M else x

    out = pl.pallas_call(
        _proto_sim_kernel,
        out_shape=jax.ShapeDtypeStruct((Mp, P), jnp.float32),
        grid=(Mp // TM,),
        in_specs=[
            pl.BlockSpec((TM, D), lambda i: (i, 0)),
            pl.BlockSpec((P, D), lambda i: (0, 0)),
        ],
        out_specs=pl.BlockSpec((TM, P), lambda i: (i, 0)),
        compiler_params=pltpu.CompilerParams(
            dimension_semantics=("parallel",)),
    )(x_p, prototypes)
    return out[:M] if Mp != M else out


# ----------------------------------------------------------------------------
# Modules (plain-JAX glue around the Pallas kernels)
# ----------------------------------------------------------------------------
class FeatureExtractor:
    """ViT-style stub: patch-embed -> single-head self-attention -> head,
    executed as a single fused Pallas kernel per image."""

    def __init__(self, key, in_ch=3, img=16, patch=PATCH,
                 backbone_dim=32, feature_dim=32):
        self.patch = patch
        self.spatial_resolution = img // patch
        self.num_patches = self.spatial_resolution ** 2
        self.backbone_dim = backbone_dim
        self.feature_dim = feature_dim
        k = jax.random.split(key, 6)
        kdim = in_ch * patch * patch
        s = 0.02
        self.w_embed = s * jax.random.normal(k[0], (kdim, backbone_dim), jnp.float32)
        self.b_embed = jnp.zeros((backbone_dim,), jnp.float32)
        wq = s * jax.random.normal(k[1], (backbone_dim, backbone_dim), jnp.float32)
        wk = s * jax.random.normal(k[2], (backbone_dim, backbone_dim), jnp.float32)
        wv = s * jax.random.normal(k[3], (backbone_dim, backbone_dim), jnp.float32)
        # Fused QKV weight: one [Din, 3*Dh] matmul inside the kernel.
        self.w_qkv = jnp.concatenate([wq, wk, wv], axis=1)
        self.w_head = s * jax.random.normal(k[4], (backbone_dim, feature_dim), jnp.float32)

    def __call__(self, x, use_head=True):
        # x: NCHW [B, C, H, W]
        B, C, H, W = x.shape
        p = self.patch
        # im2col (glue): [B, C, H/p, p, W/p, p] -> [B, N, C*p*p]
        patches = x.reshape(B, C, H // p, p, W // p, p)
        patches = patches.transpose(0, 2, 4, 1, 3, 5)
        patches = patches.reshape(B, self.num_patches, C * p * p)
        # Single fused Pallas kernel: embed + attention (+ optional head).
        features, attentions = fused_extractor_forward(
            patches, self.w_embed, self.b_embed, self.w_qkv, self.w_head,
            use_head)
        return features, attentions


class TimeT:
    def __init__(self, feature_extractor, prototype_number=10,
                 prototype_init=None, key=None):
        self.feature_extractor = feature_extractor
        if prototype_init is None:
            key = jax.random.PRNGKey(1) if key is None else key
            prototype_init = jax.random.normal(
                key, (prototype_number, feature_extractor.feature_dim),
                jnp.float32)
            prototype_init = prototype_init / jnp.sqrt(
                jnp.sum(prototype_init ** 2, axis=-1, keepdims=True) + 1e-12)
        self.prototypes = prototype_init

    def get_feature_prototype_similarity(self, x):
        # Pallas kernel: L2-normalize features, contract with prototypes
        # (no transpose materialized).
        return prototype_similarity(x, self.prototypes)

    def forward(self, x, train=False, use_head=True):
        # train=False path of the reference module (no gradients needed).
        # TODO(synk): train=True path (get_loss) needs propagate_labels /
        # sinkhorn helpers that are not part of the provided module.
        features, attentions = self.feature_extractor(x, use_head=use_head)
        return features, attentions

    __call__ = forward


# ----------------------------------------------------------------------------
if __name__ == "__main__":
    key = jax.random.PRNGKey(0)
    k_x, k_fe, k_proto = jax.random.split(key, 3)

    B, C, H, W = 2, 3, 16, 16
    x = jax.random.normal(k_x, (B, C, H, W), jnp.float32)

    fe = FeatureExtractor(k_fe, in_ch=C, img=H, patch=PATCH,
                          backbone_dim=32, feature_dim=32)
    model = TimeT(fe, prototype_number=10, key=k_proto)

    features, attentions = model(x, train=False, use_head=True)
    features = jax.block_until_ready(features)
    attentions = jax.block_until_ready(attentions)

    # Exercise the no-head path as well (w_head is not DMA'd in this call).
    backbone_features, _ = model(x, train=False, use_head=False)
    backbone_features = jax.block_until_ready(backbone_features)

    # Exercise TimeT's prototype-similarity Pallas kernel.
    bs, num_patches, dim = features.shape
    scores = model.get_feature_prototype_similarity(
        features.reshape(bs * num_patches, dim))
    scores = jax.block_until_ready(scores)

    assert features.shape == (B, fe.num_patches, fe.feature_dim)
    assert attentions.shape == (B, fe.num_patches, fe.num_patches)
    assert backbone_features.shape == (B, fe.num_patches, fe.backbone_dim)
    assert scores.shape == (B * fe.num_patches, 10)
    assert bool(jnp.all(jnp.isfinite(features)))
    assert bool(jnp.all(jnp.isfinite(attentions)))
    assert bool(jnp.all(jnp.isfinite(scores)))

    print("KERNEL_OK")
</pallas_src>

<mosaic_0001>
module attributes {stable_mosaic.version = 11 : i64} {
  func.func @_fused_extractor_kernel(%arg0: i32, %arg1: memref<1x16x48xf32, #tpu.memory_space<vmem>>, %arg2: memref<48x32xf32, #tpu.memory_space<vmem>>, %arg3: memref<1x32xf32, #tpu.memory_space<vmem>>, %arg4: memref<32x96xf32, #tpu.memory_space<vmem>>, %arg5: memref<32x32xf32, #tpu.memory_space<vmem>>, %arg6: memref<1x16x32xf32, #tpu.memory_space<vmem>>, %arg7: memref<1x16x16xf32, #tpu.memory_space<vmem>>) attributes {dimension_semantics = [#tpu.dimension_semantics<parallel>], iteration_bounds = array<i64: 2>, scalar_prefetch = 0 : i64, scratch_operands = 0 : i64, tpu.core_type = #tpu.core_type<tc>, window_params = [{transform_indices = @transform_0, window_bounds = array<i64: 1, 16, 48>}, {pipeline_mode = #tpu.pipeline_mode<synchronous>, transform_indices = @transform_1, window_bounds = array<i64: 48, 32>}, {pipeline_mode = #tpu.pipeline_mode<synchronous>, transform_indices = @transform_2, window_bounds = array<i64: 1, 32>}, {pipeline_mode = #tpu.pipeline_mode<synchronous>, transform_indices = @transform_3, window_bounds = array<i64: 32, 96>}, {pipeline_mode = #tpu.pipeline_mode<synchronous>, transform_indices = @transform_4, window_bounds = array<i64: 32, 32>}, {transform_indices = @transform_5, window_bounds = array<i64: 1, 16, 32>}, {transform_indices = @transform_6, window_bounds = array<i64: 1, 16, 16>}]} {
    %c0 = arith.constant 0 : index
    %c0_0 = arith.constant 0 : index
    %c0_1 = arith.constant 0 : index
    %0 = vector.load %arg1[%c0, %c0_0, %c0_1] : memref<1x16x48xf32, #tpu.memory_space<vmem>>, vector<1x16x48xf32>
    %1 = vector.shape_cast %0 : vector<1x16x48xf32> to vector<16x48xf32>
    %c0_2 = arith.constant 0 : index
    %c0_3 = arith.constant 0 : index
    %2 = vector.load %arg2[%c0_2, %c0_3] : memref<48x32xf32, #tpu.memory_space<vmem>>, vector<48x32xf32>
    %cst = arith.constant dense<0.000000e+00> : vector<16x32xf32>
    %3 = tpu.matmul %1, %2, %cst {dimension_numbers = #tpu.dot_dimension_numbers<[1], [0], [0], [1], [0, 0, 1, 1], [], []>} : vector<16x48xf32>, vector<48x32xf32>, vector<16x32xf32> -> vector<16x32xf32>
    %c0_4 = arith.constant 0 : index
    %c0_5 = arith.constant 0 : index
    %4 = vector.load %arg3[%c0_4, %c0_5] : memref<1x32xf32, #tpu.memory_space<vmem>>, vector<1x32xf32>
    %5 = vector.broadcast %4 : vector<1x32xf32> to vector<16x32xf32>
    %6 = arith.addf %3, %5 : vector<16x32xf32>
    %c0_6 = arith.constant 0 : index
    %c0_7 = arith.constant 0 : index
    %7 = vector.load %arg4[%c0_6, %c0_7] : memref<32x96xf32, #tpu.memory_space<vmem>>, vector<32x96xf32>
    %cst_8 = arith.constant dense<0.000000e+00> : vector<16x96xf32>
    %8 = tpu.matmul %6, %7, %cst_8 {dimension_numbers = #tpu.dot_dimension_numbers<[1], [0], [0], [1], [0, 0, 1, 1], [], []>} : vector<16x32xf32>, vector<32x96xf32>, vector<16x96xf32> -> vector<16x96xf32>
    %9 = vector.extract_strided_slice %8 {offsets = [0, 0], sizes = [16, 32], strides = [1, 1]} : vector<16x96xf32> to vector<16x32xf32>
    %10 = vector.extract_strided_slice %8 {offsets = [0, 32], sizes = [16, 32], strides = [1, 1]} : vector<16x96xf32> to vector<16x32xf32>
    %11 = vector.extract_strided_slice %8 {offsets = [0, 64], sizes = [16, 32], strides = [1, 1]} : vector<16x96xf32> to vector<16x32xf32>
    %cst_9 = arith.constant dense<0.000000e+00> : vector<16x16xf32>
    %12 = tpu.matmul %9, %10, %cst_9 {dimension_numbers = #tpu.dot_dimension_numbers<[1], [1], [0], [0], [0, 0, 1, 0], [], []>} : vector<16x32xf32>, vector<16x32xf32>, vector<16x16xf32> -> vector<16x16xf32>
    %cst_10 = arith.constant 0.176776692 : f32
    %13 = vector.broadcast %cst_10 : f32 to vector<16x16xf32>
    %14 = arith.mulf %12, %13 : vector<16x16xf32>
    %cst_11 = arith.constant dense<0xFF800000> : vector<16xf32>
    %15 = vector.multi_reduction <maximumf>, %14, %cst_11 [1] : vector<16x16xf32> to vector<16xf32>
    %16 = vector.shape_cast %15 : vector<16xf32> to vector<16x1xf32>
    %17 = vector.broadcast %16 : vector<16x1xf32> to vector<16x16xf32>
    %18 = arith.subf %14, %17 : vector<16x16xf32>
    %19 = math.exp %18 : vector<16x16xf32>
    %cst_12 = arith.constant dense<0.000000e+00> : vector<16xf32>
    %20 = vector.multi_reduction <add>, %19, %cst_12 [1] : vector<16x16xf32> to vector<16xf32>
    %21 = vector.shape_cast %20 : vector<16xf32> to vector<16x1xf32>
    %22 = tpu.reciprocal %21 {approx = true} : vector<16x1xf32> -> vector<16x1xf32>
    %23 = vector.broadcast %22 : vector<16x1xf32> to vector<16x16xf32>
    %24 = arith.mulf %19, %23 : vector<16x16xf32>
    %cst_13 = arith.constant dense<0.000000e+00> : vector<16x32xf32>
    %25 = tpu.matmul %24, %11, %cst_13 {dimension_numbers = #tpu.dot_dimension_numbers<[1], [0], [0], [1], [0, 0, 1, 1], [], []>} : vector<16x16xf32>, vector<16x32xf32>, vector<16x32xf32> -> vector<16x32xf32>
    %c0_14 = arith.constant 0 : index
    %c0_15 = arith.constant 0 : index
    %26 = vector.load %arg5[%c0_14, %c0_15] : memref<32x32xf32, #tpu.memory_space<vmem>>, vector<32x32xf32>
    %cst_16 = arith.constant dense<0.000000e+00> : vector<16x32xf32>
    %27 = tpu.matmul %25, %26, %cst_16 {dimension_numbers = #tpu.dot_dimension_numbers<[1], [0], [0], [1], [0, 0, 1, 1], [], []>} : vector<16x32xf32>, vector<32x32xf32>, vector<16x32xf32> -> vector<16x32xf32>
    %c0_17 = arith.constant 0 : index
    %c0_18 = arith.constant 0 : index
    %c0_19 = arith.constant 0 : index
    %28 = vector.load %arg6[%c0_17, %c0_18, %c0_19] : memref<1x16x32xf32, #tpu.memory_space<vmem>>, vector<1x16x32xf32>
    %29 = vector.shape_cast %28 : vector<1x16x32xf32> to vector<16x32xf32>
    %30 = vector.shape_cast %27 : vector<16x32xf32> to vector<1x16x32xf32>
    tpu.vector_store %arg6[%c0_17, %c0_18, %c0_19], %30 {strides = array<i32>} : memref<1x16x32xf32, #tpu.memory_space<vmem>>, vector<1x16x32xf32>,
    %c0_20 = arith.constant 0 : index
    %c0_21 = arith.constant 0 : index
    %c0_22 = arith.constant 0 : index
    %31 = vector.load %arg7[%c0_20, %c0_21, %c0_22] : memref<1x16x16xf32, #tpu.memory_space<vmem>>, vector<1x16x16xf32>
    %32 = vector.shape_cast %31 : vector<1x16x16xf32> to vector<16x16xf32>
    %33 = vector.shape_cast %24 : vector<16x16xf32> to vector<1x16x16xf32>
    tpu.vector_store %arg7[%c0_20, %c0_21, %c0_22], %33 {strides = array<i32>} : memref<1x16x16xf32, #tpu.memory_space<vmem>>, vector<1x16x16xf32>,
    return
  }
  func.func @transform_0(%arg0: i32) -> (i32, i32, i32) {
    %c0_i32 = arith.constant 0 : i32
    %c0_i32_0 = arith.constant 0 : i32
    %c0_i32_1 = arith.constant 0 : i32
    return %arg0, %c0_i32, %c0_i32_0 : i32, i32, i32
  }
  func.func @transform_1(%arg0: i32) -> (i32, i32) {
    %c0_i32 = arith.constant 0 : i32
    %c0_i32_0 = arith.constant 0 : i32
    %c0_i32_1 = arith.constant 0 : i32
    return %c0_i32, %c0_i32_0 : i32, i32
  }
  func.func @transform_2(%arg0: i32) -> (i32, i32) {
    %c0_i32 = arith.constant 0 : i32
    %c0_i32_0 = arith.constant 0 : i32
    %c0_i32_1 = arith.constant 0 : i32
    return %c0_i32, %c0_i32_0 : i32, i32
  }
  func.func @transform_3(%arg0: i32) -> (i32, i32) {
    %c0_i32 = arith.constant 0 : i32
    %c0_i32_0 = arith.constant 0 : i32
    %c0_i32_1 = arith.constant 0 : i32
    return %c0_i32, %c0_i32_0 : i32, i32
  }
  func.func @transform_4(%arg0: i32) -> (i32, i32) {
    %c0_i32 = arith.constant 0 : i32
    %c0_i32_0 = arith.constant 0 : i32
    %c0_i32_1 = arith.constant 0 : i32
    return %c0_i32, %c0_i32_0 : i32, i32
  }
  func.func @transform_5(%arg0: i32) -> (i32, i32, i32) {
    %c0_i32 = arith.constant 0 : i32
    %c0_i32_0 = arith.constant 0 : i32
    %c0_i32_1 = arith.constant 0 : i32
    return %arg0, %c0_i32, %c0_i32_0 : i32, i32, i32
  }
  func.func @transform_6(%arg0: i32) -> (i32, i32, i32) {
    %c0_i32 = arith.constant 0 : i32
    %c0_i32_0 = arith.constant 0 : i32
    %c0_i32_1 = arith.constant 0 : i32
    return %arg0, %c0_i32, %c0_i32_0 : i32, i32, i32
  }
}

</mosaic_0001>

<bundles_post_ra>
// kernel: tpu_custom_call.1
= control target key start
LH: loop header
LB: loop body
LE: loop exit
PB: predicated region body
PF: predicated region fallthrough
CT: control target
= control target key end

     0   :  { %12 = vsyncpa [#allocation3], 0  ;;  %s1089_s0 = inlined_call_operand.vmem [shape: f32[2,16,48], index: 0, kind: input, shape index: {}]   ;;  %s1090_s1 = inlined_call_operand.vmem [shape: f32[48,32], index: 1, kind: input, shape index: {}]   ;;  %s1091_s2 = inlined_call_operand.vmem [shape: f32[1,32], index: 2, kind: input, shape index: {}]   ;;  %s1092_s3 = inlined_call_operand.vmem [shape: f32[32,96], index: 3, kind: input, shape index: {}]   ;;  %s1093_s4 = inlined_call_operand.hbm [shape: f32[32,32], index: 4, kind: input, shape index: {}]   ;;  %s1094_s5 = inlined_call_operand.hbm [shape: f32[2,16,32], index: 5, kind: output, shape index: {0}]   ;;  %s1095_s6 = inlined_call_operand.hbm [shape: f32[2,16,16], index: 6, kind: output, shape index: {1}]  }
   0x1   :  { %13 = vsyncpa [#allocation4], 0 }
   0x2   :  { %15 = vsyncpa [#allocation4 + $0x1], 0 }
   0x3   :  { %16 = vsyncpa [#allocation7], 0 }
   0x4   :  { %18 = vsyncpa [#allocation7 + $0x1], 0  ;;  %s915_s21 = smov 0   ;;  %s917_s22 = smov 0  }
   0x5   :  { %s919_s23 = smov 0   ;;  %s921_s24 = smov 0  }
   0x6 LB: > { %s936_s25 = sadd.s32 4294967295, %s871_s24   ;;  %s633_s26 = sadd.s32 4294967294, %s871_s24   ;;  %s871_s24 = sphi %s921_s24, %s1101_s24   ;;  %s867_s23 = sphi %s919_s23, %s1100_s23   ;;  %s863_s22 = sphi %s917_s22, %s1099_s22   ;;  %s859_s21 = sphi %s915_s21, %s1098_s21  }
   0x7   : > { %s940_s27 = sadd.s32 1, %s871_s24   ;;  %s141_s28 = sadd.s32 1, %s867_s23 }
   0x8   : > { %s138_s29 = ssub.s32 %s871_s24, %s940_s27  ;;  %p151_p0 = scmp.ne.s32.totalorder %s867_s23, %s863_s22 }
   0x9   : > { %p139_p1 = scmp.eq.s32.totalorder %s138_s29, 0  ;;  %p152_p2 = scmp.eq.s32.totalorder %s936_s25, 1 }
   0xa   : > { %p157_p3 = scmp.ne.s32.totalorder %s863_s22, %s859_s21  ;;  %p158_p4 = scmp.eq.s32.totalorder %s633_s26, 1 }
   0xb   : > { %s951_s30 = scalar_select %p139_p1, %s867_s23, %s141_s28  }
   0xc   : > { %p953_p5 = por %p152_p2, %p151_p0  ;;  %p957_p6 = por %p158_p4, %p157_p3 }
   0xd   : > { %p634_p7 = scmp.ge.s32.totalorder %s871_s24, 1  ;;  %p191_p8 = scmp.lt.s32.totalorder %s871_s24, 3 }
   0xe   : > { %p687_p9 = scmp.eq.s32.totalorder %s936_s25, 0  ;;  %s211_s11 = sshll.u32 %s1093_s4, 4  ;;  %s212_s11 = int_to_ptr.hbm [resolvable:$true] %s211_s11 }
   0xf   : > { %p192_p10 = pnand %p634_p7, %p191_p8  ;;  %s873_s12 = smov [#allocation2]  }
  0x10   : > { %s213_s13 = sshll.u32 %s873_s12, 4  ;;  %s874_s14 = smov 128   ;;  %s214_s13 = int_to_ptr.vmem [resolvable:$true] %s213_s13 }
  0x11   : > { %p676_p11 = pneg %p192_p10  ;;  %s875_s15 = smov 8  }
  0x12   : > { %237 = sbr.rel (%p192_p10) target bundleno = 1087 (0x43f), region = 40 }
  0x13   : > { %p677_p12 = pnand %p687_p9, %p676_p11 }
  0x15   : > { %679 = dma.hbm_to_vmem [thread:$0]  (!%p677_p12), %s212_s11, 512, %s214_s13, [#allocation3], %s874_s14, %s874_s14, %s875_s15  }
  0x17   : > { %846 = dma.done.wait (%p687_p9), [#allocation3], 512  }
  0x18   : > { %848 = vsyncadd (%p687_p9), [#allocation3], 4294966784  ;;  %p273_p13 = scmp.lt.s32.totalorder %s936_s25, 1  ;;  %v285_v0 = vld [vmem:[%s1090_s1 + $0x28] sm:$0xff]  ;;  %v284_v1 = vld [vmem:[%s1090_s1 + $0x20] sm:$0xff]  ;;  %vm290_vm0 = vcmask 392192  }
  0x19   : > { %307 = vmatpush.msra.mxu0 %v285_v0  ;;  %v283_v2 = vld [vmem:[%s1090_s1 + $0x18] sm:$0xff]  ;;  %v322_v4 = vld [vmem:[%s1092_s3 + $0x10] sm:$0xff]  ;;  %v281_v6 = vld [vmem:[%s1090_s1 + $0x8] sm:$0xff]  ;;  %vm324_vm1 = vcmask 261120   ;;  %s876_s13 = smov 96   ;;  %s877_s14 = smov 64  }
  0x1a   : > { %s274_s16 = scalar_select %p273_p13, %s936_s25, 1  ;;  %v323_v3 = vld [vmem:[%s1092_s3 + $0x18] sm:$0xff]  ;;  %v282_v5 = vld [vmem:[%s1090_s1 + $0x10] sm:$0xff]  ;;  %v280_v7 = vld [vmem:[%s1090_s1] sm:$0xff]  ;;  %vm393_vm2 = vcmask 130048  }
  0x1b   : > { %308 = vmatpush.msra.mxu0 %v284_v1  ;;  %343 = vmatpush.msra.mxu1 %v323_v3  ;;  %v321_v10 = vld [vmem:[%s1092_s3 + $0x8] sm:$0xff]  ;;  %v320_v11 = vld [vmem:[%s1092_s3] sm:$0xff]  ;;  %v454_v41 = vld [vmem:[#allocation2 + $0x18] sm:$0xff]  ;;  %s1022_s15 = sand.u32 1, %s863_s22  }
  0x1c   : > { %s663_s10 = sshll.u32 %s274_s16, 4  ;;  %v734_v12 = vld [vmem:[%s1091_s2] ss:$0 sm:$0xff]  ;;  %v453_v42 = vld [vmem:[#allocation2 + $0x10] sm:$0xff]  ;;  %v452_v43 = vld [vmem:[#allocation2 + $0x8] sm:$0xff]  ;;  %s639_s17 = sshll.u32 %s1022_s15, 4 }
  0x1d   : > { %309 = vmatpush.msra.mxu0 %v283_v2  ;;  %344 = vmatpush.msra.mxu1 %v322_v4  ;;  %s277_s20 = scalar_lea.vmem %s1089_s0, %s663_s10  ;;  %s272_s18 = scalar_lea.vmem [#allocation6], %s639_s17  ;;  %v451_v50 = vld [vmem:[#allocation2] sm:$0xff] }
  0x1e   : > { %v278_v8 = vld [vmem:[%s277_s20] sm:$0xff]  ;;  %v279_v9 = vld [vmem:[%s277_s20 + $0x8] sm:$0xff]  ;;  %s523_s19 = sshll.u32 %s272_s18, 4  ;;  %s664_s20 = sshll.u32 %s936_s25, 4  ;;  %s524_s19 = int_to_ptr.vmem [resolvable:$true] %s523_s19 }
  0x1f   : > { %310 = vmatpush.msra.mxu0 %v282_v5  ;;  %345 = vmatpush.msra.mxu1 %v321_v10  ;;  %s522_s28 = scalar_lea.hbm %s1095_s6, %s664_s20  ;;  %s494_s9 = scalar_lea.sflag [#allocation7], %s1022_s15 }
  0x20   : > { %s525_s29 = sshll.u32 %s522_s28, 4  ;;  %s526_s29 = int_to_ptr.hbm [resolvable:$true] %s525_s29 }
  0x21   : > { %311 = vmatpush.msra.mxu0 %v281_v6  ;;  %346 = vmatpush.msra.mxu1 %v320_v11  ;;  %s787_s11 = sshra.s32 %s526_s29, 4  ;;  %s788_s11 = int_to_ptr.hbm [resolvable:$true] %s787_s11 }
  0x22   : > { %s789_s10 = scalar_lea.hbm %s788_s11, 16  ;;  %p794_p3 = scmp.lt.s32.totalorder %s788_s11, %s1095_s6 }
  0x23   : > { %312 = vmatpush.msra.mxu0 %v280_v7  ;;  %p790_p0 = scmp.ne.s32.totalorder %s788_s11, %s789_s10 }
  0x24   : > { %643 = vmatmul.msk.f32.vlgmr.msra.gmra.mxu0 %vm290_vm0, %v278_v8 }
  0x25   : > { %p791_p1 = pnand %p790_p0, %p953_p5 }
  0x27   : > { %p792_p2 = pneg %p791_p1 }
  0x2c   : > { %644 = vmatmul.msk.f32.gmra.mxu0 %vm290_vm0, %v279_v9 }
  0xa1   : > { %v314_v13 = vpop.f32.mrf.mxu0 }
  0xa2   : > { %v315_v14 = vadd.f32 %v734_v12, %v314_v13 }
  0xa4   : > { %645 = vmatmul.msk.f32.vlgmr.msra.gmra.mxu1 %vm324_vm1, %v315_v14 }
  0xa9   : > { %v317_v15 = vpop.f32.mrf.mxu0 }
  0xaa   : > { %v318_v16 = vadd.f32 %v734_v12, %v317_v15 }
  0xac   : > { %646 = vmatmul.msk.f32.gmra.mxu1 %vm324_vm1, %v318_v16 }
 0x121   : > { %v348_v17 = vpop.f32.mrf.mxu1 }
 0x129   : > { %v351_v18 = vpop.f32.mrf.mxu1 }
 0x12a   : > { %358 = vrot.lane.b32.xlu0 %v351_v18, %s876_s13  ;;  %v729_v19 = vpack.i.bf16 %v348_v17, %v351_v18 }
 0x132   : > { %356 = vrot.lane.b32.xlu0 %v348_v17, %s876_s13 }
 0x13a   : > { %730 = vrot.lane.b32.xlu0 %v729_v19, %s877_s14  ;;  %s793_s14 = scalar_lea.hbm %s1095_s6, 32 }
 0x13b   : > { %p795_p4 = scmp.lt.s32.totalorder %s793_s14, %s789_s10 }
 0x13d   : > { %p796_p7 = por %p795_p4, %p794_p3 }
 0x13f   : > { %p797_p8 = pnand %p796_p7, %p792_p2 }
 0x19c   : > { %v359_v20 = vpop.permute.xlu0 %358 }
 0x19d   : > { %647 = vmatpush.xpose.msk.msra.mxu2 %vm324_vm1, %v359_v20 }
 0x1a4   : > { %v357_v21 = vpop.permute.xlu0 %356 }
 0x1a5   : > { %648 = vmatpush.xpose.msk.msra.mxu2 %vm324_vm1, %v357_v21 }
 0x1a8   : > { %649 = vmatmul.msk.f32.vlgmr.msra.gmra.mxu2 %vm324_vm1, %v348_v17 }
 0x1ac   : > { %v731_v22 = vpop.permute.xlu0 %730 }
 0x1ad   : > { %v732_v23 = vunpack.i.l.bf16 %v731_v22  ;;  %v733_v24 = vunpack.i.h.bf16 %v731_v22 }
 0x1af   : > { %442 = vmatpush.msrb.mxu1 %v732_v23  ;;  %666 = vmatpush.msra.mxu3 %v732_v23 }
 0x1b0   : > { %650 = vmatmul.msk.f32.gmra.mxu2 %vm324_vm1, %v351_v18 }
 0x1b1   : > { %443 = vmatpush.msrb.mxu1 %v733_v24  ;;  %667 = vmatpush.msra.mxu3 %v733_v24 }
 0x1b3   : > { %473 = vmatpush.msrb.mxu3 %v454_v41 }
 0x1b5   : > { %474 = vmatpush.msrb.mxu3 %v453_v42 }
 0x1b7   : > { %475 = vmatpush.msrb.mxu3 %v452_v43 }
 0x1b9   : > { %476 = vmatpush.msrb.mxu3 %v451_v50 }
 0x22b   : > { %v385_v25 = vpop.f32.mrf.mxu2 }
 0x22c   : > { %v391_v26 = vmul.f32 0.17677669, %v385_v25 }
 0x22e   : > { %v394_v27 = vsel %vm393_vm2, %v391_v26, -inf }
 0x22f   : > { %395 = vmax.xlane.f32.xlu1 %v394_v27 }
 0x233   : > { %v388_v28 = vpop.f32.mrf.mxu2 }
 0x234   : > { %v392_v29 = vmul.f32 0.17677669, %v388_v28 }
 0x236   : > { %v397_v30 = vsel %vm393_vm2, %v392_v29, -inf }
 0x237   : > { %398 = vmax.xlane.f32.xlu1 %v397_v30 }
 0x2a2   : > { %v396_v31 = vpop.xlane.xlu1 %395 }
 0x2a3   : > { %v400_v32 = vsub.f32 %v391_v26, %v396_v31 }
 0x2a5   : > { %v402_v33 = vmul.f32 1.442695, %v400_v32 }
 0x2a7   : > { %735 = vpow2.f32 %v402_v33 }
 0x2aa   : > { %v399_v34 = vpop.xlane.xlu1 %398 }
 0x2ab   : > { %v401_v35 = vsub.f32 %v392_v29, %v399_v34 }
 0x2ad   : > { %v736_v36 = vpop.eup %735  ;;  %v404_v37 = vmul.f32 1.442695, %v401_v35 }
 0x2ae   : > { %v406_v38 = vsel %vm393_vm2, %v736_v36, 0.0 }
 0x2af   : > { %737 = vpow2.f32 %v404_v37  ;;  %407 = vadd.xlane.f32.xlu2 %v406_v38 }
 0x2b5   : > { %v738_v39 = vpop.eup %737 }
 0x2b6   : > { %v409_v40 = vsel %vm393_vm2, %v738_v39, 0.0 }
 0x2b7   : > { %410 = vadd.xlane.f32.xlu2 %v409_v40 }
 0x322   : > { %v408_v44 = vpop.xlane.xlu2 %407 }
 0x323   : > { %739 = vrcp.f32 %v408_v44 }
 0x329   : > { %v740_v45 = vpop.eup %739 }
 0x32a   : > { %v411_v46 = vpop.xlane.xlu2 %410  ;;  %v414_v47 = vmul.f32 %v740_v45, %v736_v36 }
 0x32b   : > { %741 = vrcp.f32 %v411_v46 }
 0x32c   : > { %651 = vmatmul.msk.f32.vlgmr.msrb.gmra.mxu1 %vm393_vm2, %v414_v47  ;;  %486 = vst.msk [vmem:[%s272_s18] sm:$0xff] %vm393_vm2, %v414_v47 }
 0x331   : > { %v742_v48 = vpop.eup %741 }
 0x332   : > { %v415_v49 = vmul.f32 %v742_v48, %v738_v39 }
 0x334   : > { %652 = vmatmul.msk.f32.vlgmr.msra.gmra.mxu3 %vm393_vm2, %v415_v49  ;;  %487 = vst.msk [vmem:[%s272_s18 + $0x8] sm:$0xff] %vm393_vm2, %v415_v49 }
 0x3a9   : > { %v445_v51 = vpop.f32.mrf.mxu1 }
 0x3aa   : > { %653 = vmatmul.msk.f32.vlgmr.msrb.gmra.mxu3 %vm324_vm1, %v445_v51 }
 0x3b7   : > { %v448_v52 = vpop.f32.mrf.mxu3 }
 0x3b8   : > { %654 = vmatmul.msk.f32.gmra.mxu3 %vm324_vm1, %v448_v52 }
 0x3b9   : > { %800 = shalt.err (!%p797_p8)
}
 0x3ba   : > { %s878_s16 = smov 128   ;;  %s879_s26 = smov 8  }
 0x3bb   : > { %673 = dma.vmem_to_hbm [thread:$0]  (%p953_p5), %s524_s19, 256, %s526_s29, %s494_s9, %s878_s16, %s878_s16, %s879_s26  }
 0x3bc   : > { %s265_s28 = scalar_lea.vmem [#allocation5], %s639_s17  ;;  %s505_s12 = scalar_lea.hbm %s1094_s5, %s664_s20 }
 0x3bd   : > { %s506_s13 = sshll.u32 %s265_s28, 4  ;;  %s508_s14 = sshll.u32 %s505_s12, 4  ;;  %s507_s13 = int_to_ptr.vmem [resolvable:$true] %s506_s13  ;;  %s509_s14 = int_to_ptr.hbm [resolvable:$true] %s508_s14 }
 0x3be   : > { %s489_s25 = scalar_lea.sflag [#allocation4], %s1022_s15  ;;  %s815_s18 = sshra.s32 %s509_s14, 4  ;;  %s816_s18 = int_to_ptr.hbm [resolvable:$true] %s815_s18 }
 0x3bf   : > { %s817_s19 = scalar_lea.hbm %s816_s18, 16  ;;  %s821_s9 = scalar_lea.hbm %s1094_s5, 32 }
 0x3c0   : > { %p818_p9 = scmp.ne.s32.totalorder %s816_s18, %s817_s19  ;;  %p822_p12 = scmp.lt.s32.totalorder %s816_s18, %s1094_s5 }
 0x3c1   : > { %p823_p13 = scmp.lt.s32.totalorder %s821_s9, %s817_s19 }
 0x3c2   : > { %p819_p10 = pnand %p818_p9, %p953_p5 }
 0x3c3   : > { %p824_p0 = por %p823_p13, %p822_p12 }
 0x3c4   : > { %p820_p11 = pneg %p819_p10 }
 0x3c6   : > { %p825_p1 = pnand %p824_p0, %p820_p11 }
 0x42d   : > { %v478_v53 = vpop.f32.mrf.mxu3 }
 0x42e   : > { %484 = vst.msk [vmem:[%s265_s28] sm:$0xff] %vm324_vm1, %v478_v53 }
 0x43b   : > { %v481_v54 = vpop.f32.mrf.mxu3 }
 0x43c   : > { %485 = vst.msk [vmem:[%s265_s28 + $0x8] sm:$0xff] %vm324_vm1, %v481_v54 }
 0x43d   : > { %828 = shalt.err (!%p825_p1)
}
 0x43e   : > { %672 = dma.vmem_to_hbm [thread:$0]  (%p953_p5), %s507_s13, 256, %s509_s14, %s489_s25, %s878_s16, %s878_s16, %s879_s26  }
 0x43f PF: > { %p689_p2 = scmp.ge.s32.totalorder %s871_s24, 2  ;;  %s540_s15 = sand.u32 1, %s859_s21  }
 0x440   : > { %s541_s28 = scalar_lea.sflag [#allocation4], %s540_s15 }
 0x441   : > { %p681_p3 = pnand %p689_p2, %p957_p6 }
 0x443   : > { %p682_p4 = pneg %p681_p3 }
 0x445   : > { %850 = dma.done.wait (%p682_p4), %s541_s28, 256  }
 0x446   : > { %852 = vsyncadd (%p682_p4), %s541_s28, 4294967040  ;;  %s551_s10 = scalar_lea.sflag [#allocation7], %s540_s15 }
 0x447   : > { %854 = dma.done.wait (%p682_p4), %s551_s10, 256  }
 0x448   : > { %856 = vsyncadd (%p682_p4), %s551_s10, 4294967040  ;;  %p21_p5 = scmp.ge.s32.totalorder %s940_s27, 4   ;;  %s1098_s21 = smov %s863_s22 }
 0x449   : > { %s1099_s22 = smov %s867_s23  ;;  %s1100_s23 = smov %s951_s30 }
 0x44a   : > { %s1101_s24 = smov %s940_s27  ;;  %23 = sbr.rel (!%p21_p5) target bundleno = 6 (0x6), region = 97 }
 0x44f   :  { %557 = vsyncpa [#allocation3], 1 }
 0x450   :  { %559 = vsyncpa [#allocation3 + $0x1], 1 }
 0x451   :  { %560 = vsyncpa [#allocation4], 1 }
 0x452   :  { %562 = vsyncpa [#allocation4 + $0x1], 1 }
 0x453   :  { %563 = vsyncpa [#allocation7], 1 }
 0x454   :  { %565 = vsyncpa [#allocation7 + $0x1], 1 }

</bundles_post_ra>
